<compile_context>
chip_gen: v7x
topology: tpu7x:2x2x1
jax: 0.10.0
libtpu: 0.0.40
codegen_flags: <defaults>
</compile_context>

<pallas_src>
import jax
import jax.numpy as jnp
from jax.experimental import pallas as pl
from jax.experimental.pallas import tpu as pltpu


def _attention_gate_kernel(g_ref, x_ref, wg_ref, wx_ref, b_ref, wpsi_ref,
                           bpsi_ref, out_ref):
    # Blocks: g/x/out are (1, C, TS); weights are (C, C); biases (C, 1)/(1, 1).
    gf = g_ref[0].astype(jnp.float32)            # (C, TS)
    xf = x_ref[0].astype(jnp.float32)            # (C, TS)

    # 1x1 convs (+ folded BN) as (C, C) @ (C, TS) MXU matmuls, f32 accumulation.
    # Lane dim = spatial -> dense vregs and unmasked stores regardless of C.
    a = jnp.dot(wg_ref[...], gf, preferred_element_type=jnp.float32)
    a = a + jnp.dot(wx_ref[...], xf, preferred_element_type=jnp.float32)
    a = jnp.maximum(a + b_ref[...], 0.0)         # single fused bias (bg'+bx')

    # psi projection: VPU multiply + cross-sublane (XLU) reduction instead of a
    # wasteful 1-output-column MXU matmul.
    psi = jnp.sum(a * wpsi_ref[...], axis=0, keepdims=True) + bpsi_ref[...]
    psi = jax.nn.sigmoid(psi)                    # (1, TS)

    # Gate the skip-connection features (sublane broadcast of psi over C).
    out_ref[0] = (xf * psi).astype(out_ref.dtype)


def _fold_bn(w, b, gamma, beta, mean, var, eps=1e-5):
    """Fold inference-mode BatchNorm into a (C_in, C_out) weight / (C_out,) bias."""
    scale = gamma / jnp.sqrt(var + eps)          # (C_out,)
    w_f = w * scale[None, :]                     # scale each output channel
    b_f = (b - mean) * scale + beta
    return w_f, b_f


def _vmem_capacity_bytes():
    """Physical VMEM of the local TPU (conservative fallback if unavailable)."""
    try:
        info = pltpu.get_tpu_info()
        cap = getattr(info, "vmem_capacity_bytes", None)
        if cap:
            return int(cap)
    except Exception:
        pass
    return 64 << 20          # conservative: v7x-sized budget works everywhere


def _choose_tile_s(S, C, itemsize, cap_bytes):
    """Largest lane-aligned spatial tile that fits the pipelined VMEM budget."""
    tile_budget = cap_bytes // 3                       # leave room for weights / scratch
    # Per spatial column: double-buffered g/x/out tiles + f32 in-kernel temporaries.
    per_col = C * (2 * 3 * itemsize + 6 * 4)
    ts = int(tile_budget // max(per_col, 1))
    ts = max(128, min(ts, 4096))
    ts = (ts // 128) * 128
    if S < 128:
        return int(S)                                  # block spans full spatial dim
    s_aligned = int(pl.cdiv(S, 128)) * 128
    return int(min(ts, s_aligned))


def attention_gate(g, x, params, *, tile_s=None):
    """g, x: (N, C, H, W) (NCHW, PyTorch convention). Returns (N, C, H, W)."""
    N, C, H, W = g.shape
    assert x.shape == (N, C, H, W)
    S = H * W

    # Fold BN into the 1x1 conv weights (plain-JAX glue, inference mode).
    wg, bg = _fold_bn(params["wg"], params["bg"], params["g_gamma"],
                      params["g_beta"], params["g_mean"], params["g_var"])
    wx, bx = _fold_bn(params["wx"], params["bx"], params["x_gamma"],
                      params["x_beta"], params["x_mean"], params["x_var"])
    wpsi, bpsi = _fold_bn(params["wpsi"], params["bpsi"], params["p_gamma"],
                          params["p_beta"], params["p_mean"], params["p_var"])

    # NCHW-native operands: weights as (C_out, C_in), biases as columns.
    wg_oc = jnp.asarray(wg, jnp.float32).T            # (C_out, C_in)
    wx_oc = jnp.asarray(wx, jnp.float32).T            # (C_out, C_in)
    b_sum = jnp.asarray(bg + bx, jnp.float32).reshape(C, 1)   # fused bias
    wpsi_c = jnp.asarray(wpsi, jnp.float32).reshape(C, 1)
    bpsi_2 = jnp.asarray(bpsi, jnp.float32).reshape(1, 1)

    # (N, C, H, W) -> (N, C, S): free reshape, no transpose, no extra HBM pass.
    g_flat = g.reshape(N, C, S)
    x_flat = x.reshape(N, C, S)

    itemsize = jnp.dtype(x.dtype).itemsize
    cap = _vmem_capacity_bytes()
    ts = int(tile_s) if tile_s is not None else _choose_tile_s(S, C, itemsize, cap)

    # Pad spatial to a tile multiple for ragged shapes (sliced off afterwards).
    s_tiles = int(pl.cdiv(S, ts))
    S_pad = s_tiles * ts
    if S_pad != S:
        pad = ((0, 0), (0, 0), (0, S_pad - S))
        g_flat = jnp.pad(g_flat, pad)
        x_flat = jnp.pad(x_flat, pad)

    grid = (N, s_tiles)
    vmem_limit = int(max(32 << 20, min(cap * 3 // 4, 96 << 20)))

    out_flat = pl.pallas_call(
        _attention_gate_kernel,
        out_shape=jax.ShapeDtypeStruct((N, C, S_pad), x.dtype),
        grid_spec=pltpu.PrefetchScalarGridSpec(
            num_scalar_prefetch=0,
            grid=grid,
            in_specs=[
                pl.BlockSpec((1, C, ts), lambda n, s: (n, 0, s)),   # g tile
                pl.BlockSpec((1, C, ts), lambda n, s: (n, 0, s)),   # x tile
                pl.BlockSpec((C, C), lambda n, s: (0, 0)),          # Wg' (C_out, C_in)
                pl.BlockSpec((C, C), lambda n, s: (0, 0)),          # Wx'
                pl.BlockSpec((C, 1), lambda n, s: (0, 0)),          # bg' + bx'
                pl.BlockSpec((C, 1), lambda n, s: (0, 0)),          # wpsi'
                pl.BlockSpec((1, 1), lambda n, s: (0, 0)),          # bpsi'
            ],
            out_specs=pl.BlockSpec((1, C, ts), lambda n, s: (n, 0, s)),
        ),
        compiler_params=pltpu.CompilerParams(
            dimension_semantics=("parallel", "parallel"),
            vmem_limit_bytes=vmem_limit,
        ),
    )(g_flat, x_flat, wg_oc, wx_oc, b_sum, wpsi_c, bpsi_2)

    if S_pad != S:
        out_flat = out_flat[:, :, :S]
    return out_flat.reshape(N, C, H, W)


def init_params(key, out_channels):
    """Deterministic synthetic parameters (shapes match the PyTorch module).

    Conv weights stored as (C_in, C_out) matrices (== torch weight[:, :, 0, 0].T).
    """
    C = out_channels
    ks = jax.random.split(key, 8)
    p = {
        # W_g branch
        "wg": jax.random.normal(ks[0], (C, C), jnp.float32) * 0.1,
        "bg": jax.random.normal(ks[1], (C,), jnp.float32) * 0.1,
        "g_gamma": jnp.ones((C,), jnp.float32) * 1.1,
        "g_beta": jnp.full((C,), 0.05, jnp.float32),
        "g_mean": jnp.full((C,), 0.02, jnp.float32),
        "g_var": jnp.ones((C,), jnp.float32) * 0.9,
        # W_x branch
        "wx": jax.random.normal(ks[2], (C, C), jnp.float32) * 0.1,
        "bx": jax.random.normal(ks[3], (C,), jnp.float32) * 0.1,
        "x_gamma": jnp.ones((C,), jnp.float32) * 0.95,
        "x_beta": jnp.full((C,), -0.03, jnp.float32),
        "x_mean": jnp.full((C,), 0.01, jnp.float32),
        "x_var": jnp.ones((C,), jnp.float32) * 1.1,
        # psi branch (C -> 1)
        "wpsi": jax.random.normal(ks[4], (C, 1), jnp.float32) * 0.1,
        "bpsi": jax.random.normal(ks[5], (1,), jnp.float32) * 0.1,
        "p_gamma": jnp.ones((1,), jnp.float32) * 1.05,
        "p_beta": jnp.full((1,), 0.02, jnp.float32),
        "p_mean": jnp.full((1,), 0.0, jnp.float32),
        "p_var": jnp.ones((1,), jnp.float32),
    }
    return p


def _reference(g, x, params):
    """Pure-JAX reference of the same forward (inference-mode BN), NCHW."""
    wg, bg = _fold_bn(params["wg"], params["bg"], params["g_gamma"],
                      params["g_beta"], params["g_mean"], params["g_var"])
    wx, bx = _fold_bn(params["wx"], params["bx"], params["x_gamma"],
                      params["x_beta"], params["x_mean"], params["x_var"])
    wpsi, bpsi = _fold_bn(params["wpsi"], params["bpsi"], params["p_gamma"],
                          params["p_beta"], params["p_mean"], params["p_var"])
    N, C, H, W = g.shape
    gf = g.reshape(N, C, H * W)
    xf = x.reshape(N, C, H * W)
    g1 = jnp.einsum("io,nis->nos", wg, gf) + bg[None, :, None]
    x1 = jnp.einsum("io,nis->nos", wx, xf) + bx[None, :, None]
    a = jnp.maximum(g1 + x1, 0.0)
    psi = jax.nn.sigmoid(jnp.einsum("io,nis->nos", wpsi, a) + bpsi[None, :, None])
    return (xf * psi).reshape(N, C, H, W)


if __name__ == "__main__":
    key = jax.random.PRNGKey(0)
    k_g, k_x, k_p = jax.random.split(key, 3)

    N, C, H, Wd = 2, 4, 16, 16           # batch=2, out_channels=4, spatial=16
    g = jax.random.normal(k_g, (N, C, H, Wd), jnp.float32)
    x = jax.random.normal(k_x, (N, C, H, Wd), jnp.float32)
    params = init_params(k_p, C)

    out = attention_gate(g, x, params)
    out = jax.block_until_ready(out)

    ref = _reference(g, x, params)
    assert out.shape == (N, C, H, Wd)
    assert jnp.allclose(out, ref, atol=1e-5, rtol=1e-5), "mismatch vs reference"

    print("KERNEL_OK")
</pallas_src>

<mosaic_0001>
module attributes {stable_mosaic.version = 11 : i64} {
  func.func @_attention_gate_kernel(%arg0: i32, %arg1: i32, %arg2: memref<1x4x256xf32, #tpu.memory_space<vmem>>, %arg3: memref<1x4x256xf32, #tpu.memory_space<vmem>>, %arg4: memref<4x4xf32, #tpu.memory_space<vmem>>, %arg5: memref<4x4xf32, #tpu.memory_space<vmem>>, %arg6: memref<4x1xf32, #tpu.memory_space<vmem>>, %arg7: memref<4x1xf32, #tpu.memory_space<vmem>>, %arg8: memref<1x1xf32, #tpu.memory_space<vmem>>, %arg9: memref<1x4x256xf32, #tpu.memory_space<vmem>>) attributes {dimension_semantics = [#tpu.dimension_semantics<parallel>, #tpu.dimension_semantics<parallel>], iteration_bounds = array<i64: 2, 1>, scalar_prefetch = 0 : i64, scratch_operands = 0 : i64, tpu.core_type = #tpu.core_type<tc>, window_params = [{transform_indices = @transform_0, window_bounds = array<i64: 1, 4, 256>}, {transform_indices = @transform_1, window_bounds = array<i64: 1, 4, 256>}, {pipeline_mode = #tpu.pipeline_mode<synchronous>, transform_indices = @transform_2, window_bounds = array<i64: 4, 4>}, {pipeline_mode = #tpu.pipeline_mode<synchronous>, transform_indices = @transform_3, window_bounds = array<i64: 4, 4>}, {pipeline_mode = #tpu.pipeline_mode<synchronous>, transform_indices = @transform_4, window_bounds = array<i64: 4, 1>}, {pipeline_mode = #tpu.pipeline_mode<synchronous>, transform_indices = @transform_5, window_bounds = array<i64: 4, 1>}, {pipeline_mode = #tpu.pipeline_mode<synchronous>, transform_indices = @transform_6, window_bounds = array<i64: 1, 1>}, {transform_indices = @transform_7, window_bounds = array<i64: 1, 4, 256>}]} {
    %c0 = arith.constant 0 : index
    %c0_0 = arith.constant 0 : index
    %c0_1 = arith.constant 0 : index
    %0 = vector.load %arg2[%c0, %c0_0, %c0_1] : memref<1x4x256xf32, #tpu.memory_space<vmem>>, vector<1x4x256xf32>
    %1 = vector.shape_cast %0 : vector<1x4x256xf32> to vector<4x256xf32>
    %c0_2 = arith.constant 0 : index
    %c0_3 = arith.constant 0 : index
    %c0_4 = arith.constant 0 : index
    %2 = vector.load %arg3[%c0_2, %c0_3, %c0_4] : memref<1x4x256xf32, #tpu.memory_space<vmem>>, vector<1x4x256xf32>
    %3 = vector.shape_cast %2 : vector<1x4x256xf32> to vector<4x256xf32>
    %c0_5 = arith.constant 0 : index
    %c0_6 = arith.constant 0 : index
    %4 = vector.load %arg4[%c0_5, %c0_6] : memref<4x4xf32, #tpu.memory_space<vmem>>, vector<4x4xf32>
    %cst = arith.constant dense<0.000000e+00> : vector<4x256xf32>
    %5 = tpu.matmul %4, %1, %cst {dimension_numbers = #tpu.dot_dimension_numbers<[1], [0], [0], [1], [0, 0, 1, 1], [], []>} : vector<4x4xf32>, vector<4x256xf32>, vector<4x256xf32> -> vector<4x256xf32>
    %c0_7 = arith.constant 0 : index
    %c0_8 = arith.constant 0 : index
    %6 = vector.load %arg5[%c0_7, %c0_8] : memref<4x4xf32, #tpu.memory_space<vmem>>, vector<4x4xf32>
    %cst_9 = arith.constant dense<0.000000e+00> : vector<4x256xf32>
    %7 = tpu.matmul %6, %3, %cst_9 {dimension_numbers = #tpu.dot_dimension_numbers<[1], [0], [0], [1], [0, 0, 1, 1], [], []>} : vector<4x4xf32>, vector<4x256xf32>, vector<4x256xf32> -> vector<4x256xf32>
    %8 = arith.addf %5, %7 : vector<4x256xf32>
    %c0_10 = arith.constant 0 : index
    %c0_11 = arith.constant 0 : index
    %9 = vector.load %arg6[%c0_10, %c0_11] : memref<4x1xf32, #tpu.memory_space<vmem>>, vector<4x1xf32>
    %10 = vector.broadcast %9 : vector<4x1xf32> to vector<4x256xf32>
    %11 = arith.addf %8, %10 : vector<4x256xf32>
    %cst_12 = arith.constant 0.000000e+00 : f32
    %12 = vector.broadcast %cst_12 : f32 to vector<4x256xf32>
    %13 = arith.maximumf %11, %12 : vector<4x256xf32>
    %c0_13 = arith.constant 0 : index
    %c0_14 = arith.constant 0 : index
    %14 = vector.load %arg7[%c0_13, %c0_14] : memref<4x1xf32, #tpu.memory_space<vmem>>, vector<4x1xf32>
    %15 = vector.broadcast %14 : vector<4x1xf32> to vector<4x256xf32>
    %16 = arith.mulf %13, %15 : vector<4x256xf32>
    %cst_15 = arith.constant dense<0.000000e+00> : vector<256xf32>
    %17 = vector.multi_reduction <add>, %16, %cst_15 [0] : vector<4x256xf32> to vector<256xf32>
    %18 = vector.shape_cast %17 : vector<256xf32> to vector<1x256xf32>
    %c0_16 = arith.constant 0 : index
    %c0_17 = arith.constant 0 : index
    %19 = vector.load %arg8[%c0_16, %c0_17] : memref<1x1xf32, #tpu.memory_space<vmem>>, vector<1x1xf32>
    %20 = vector.broadcast %19 : vector<1x1xf32> to vector<1x256xf32>
    %21 = arith.addf %18, %20 : vector<1x256xf32>
    %22 = arith.negf %21 : vector<1x256xf32>
    %23 = math.exp %22 : vector<1x256xf32>
    %cst_18 = arith.constant 1.000000e+00 : f32
    %24 = vector.broadcast %cst_18 : f32 to vector<1x256xf32>
    %25 = arith.addf %24, %23 : vector<1x256xf32>
    %26 = arith.divf %24, %25 : vector<1x256xf32>
    %27 = vector.broadcast %26 : vector<1x256xf32> to vector<4x256xf32>
    %28 = arith.mulf %3, %27 : vector<4x256xf32>
    %c0_19 = arith.constant 0 : index
    %c0_20 = arith.constant 0 : index
    %c0_21 = arith.constant 0 : index
    %29 = vector.load %arg9[%c0_19, %c0_20, %c0_21] : memref<1x4x256xf32, #tpu.memory_space<vmem>>, vector<1x4x256xf32>
    %30 = vector.shape_cast %29 : vector<1x4x256xf32> to vector<4x256xf32>
    %31 = vector.shape_cast %28 : vector<4x256xf32> to vector<1x4x256xf32>
    tpu.vector_store %arg9[%c0_19, %c0_20, %c0_21], %31 {strides = array<i32>} : memref<1x4x256xf32, #tpu.memory_space<vmem>>, vector<1x4x256xf32>,
    return
  }
  func.func @transform_0(%arg0: i32, %arg1: i32) -> (i32, i32, i32) {
    %c0_i32 = arith.constant 0 : i32
    %c0_i32_0 = arith.constant 0 : i32
    return %arg0, %c0_i32, %arg1 : i32, i32, i32
  }
  func.func @transform_1(%arg0: i32, %arg1: i32) -> (i32, i32, i32) {
    %c0_i32 = arith.constant 0 : i32
    %c0_i32_0 = arith.constant 0 : i32
    return %arg0, %c0_i32, %arg1 : i32, i32, i32
  }
  func.func @transform_2(%arg0: i32, %arg1: i32) -> (i32, i32) {
    %c0_i32 = arith.constant 0 : i32
    %c0_i32_0 = arith.constant 0 : i32
    %c0_i32_1 = arith.constant 0 : i32
    return %c0_i32, %c0_i32_0 : i32, i32
  }
  func.func @transform_3(%arg0: i32, %arg1: i32) -> (i32, i32) {
    %c0_i32 = arith.constant 0 : i32
    %c0_i32_0 = arith.constant 0 : i32
    %c0_i32_1 = arith.constant 0 : i32
    return %c0_i32, %c0_i32_0 : i32, i32
  }
  func.func @transform_4(%arg0: i32, %arg1: i32) -> (i32, i32) {
    %c0_i32 = arith.constant 0 : i32
    %c0_i32_0 = arith.constant 0 : i32
    %c0_i32_1 = arith.constant 0 : i32
    return %c0_i32, %c0_i32_0 : i32, i32
  }
  func.func @transform_5(%arg0: i32, %arg1: i32) -> (i32, i32) {
    %c0_i32 = arith.constant 0 : i32
    %c0_i32_0 = arith.constant 0 : i32
    %c0_i32_1 = arith.constant 0 : i32
    return %c0_i32, %c0_i32_0 : i32, i32
  }
  func.func @transform_6(%arg0: i32, %arg1: i32) -> (i32, i32) {
    %c0_i32 = arith.constant 0 : i32
    %c0_i32_0 = arith.constant 0 : i32
    %c0_i32_1 = arith.constant 0 : i32
    return %c0_i32, %c0_i32_0 : i32, i32
  }
  func.func @transform_7(%arg0: i32, %arg1: i32) -> (i32, i32, i32) {
    %c0_i32 = arith.constant 0 : i32
    %c0_i32_0 = arith.constant 0 : i32
    return %arg0, %c0_i32, %arg1 : i32, i32, i32
  }
}

</mosaic_0001>

<bundles_post_ra>
// kernel: tpu_custom_call.1
= control target key start
LH: loop header
LB: loop body
LE: loop exit
PB: predicated region body
PF: predicated region fallthrough
CT: control target
= control target key end

     0   :  { %s1172_s0 = inlined_call_operand.hbm [shape: f32[2,4,256], index: 0, kind: input, shape index: {}]   ;;  %s1173_s1 = inlined_call_operand.vmem [shape: f32[2,4,256], index: 1, kind: input, shape index: {}]   ;;  %s1174_s2 = inlined_call_operand.vmem [shape: f32[4,4], index: 2, kind: input, shape index: {}]   ;;  %s1175_s3 = inlined_call_operand.vmem [shape: f32[4,4], index: 3, kind: input, shape index: {}]   ;;  %s1176_s4 = inlined_call_operand.vmem [shape: f32[4,1], index: 4, kind: input, shape index: {}]   ;;  %s1177_s5 = inlined_call_operand.vmem [shape: f32[4,1], index: 5, kind: input, shape index: {}]   ;;  %s1178_s6 = inlined_call_operand.<no memory space> [shape: f32[1,1], index: 6, kind: input, shape index: {}]   ;;  %s1179_s7 = inlined_call_operand.hbm [shape: f32[2,4,256], index: 7, kind: output, shape index: {}]  }
   0x1   :  { %v12_v0 = vstv %s1178_s6 }
   0x2   :  { %13 = vst [vmem:[#allocation2] sm:$0x1] %v12_v0 }
   0x3   :  { %14 = vsyncpa [#allocation4], 0 }
   0x4   :  { %16 = vsyncpa [#allocation4 + $0x1], 0 }
   0x5   :  { %17 = vsyncpa [#allocation5], 0 }
   0x6   :  { %19 = vsyncpa [#allocation5 + $0x1], 0  ;;  %s967_s26 = smov 0   ;;  %s969_s27 = smov 0  }
   0x7   :  { %s971_s28 = smov 0   ;;  %s973_s29 = smov 0  }
   0x8   :  { %s975_s30 = smov 0   ;;  %s977_s8 = smov 0  }
   0x9 LB: > { %s700_s6 = sadd.s32 4294967295, %s918_s8   ;;  %s701_s9 = sadd.s32 4294967294, %s918_s8   ;;  %s918_s8 = sphi %s977_s8, %s25_s8   ;;  %s914_s30 = sphi %s975_s30, %s1195_s30   ;;  %s910_s29 = sphi %s973_s29, %s1194_s29   ;;  %s906_s28 = sphi %s971_s28, %s1193_s28   ;;  %s902_s27 = sphi %s969_s27, %s1192_s27   ;;  %s898_s26 = sphi %s967_s26, %s1191_s26  }
   0xa   : > { %s37_s10 = sadd.s32 1, %s914_s30  ;;  %s46_s11 = sadd.s32 1, %s906_s28 }
   0xb   : > { %p39_p0 = scmp.ge.s32.totalorder %s37_s10, 2  ;;  %p53_p1 = scmp.ne.s32.totalorder %s906_s28, %s902_s27 }
   0xc   : > { %p54_p2 = scmp.eq.s32.totalorder %s918_s8, 0  ;;  %p59_p3 = scmp.ne.s32.totalorder %s902_s27, %s898_s26 }
   0xd   : > { %s1197_s10 = smov (%p39_p0, %s37_s10), 0  ;;  %p60_p5 = scmp.eq.s32.totalorder %s700_s6, 0 }
   0xe   : > { %p1008_p4 = por %p54_p2, %p53_p1  ;;  %s41_s13 = ssub.s32 %s914_s30, %s1197_s10 }
   0xf   : > { %p218_p6 = scmp.eq.s32.totalorder %s700_s6, 1  ;;  %p44_p7 = scmp.eq.s32.totalorder %s41_s13, 0 }
  0x10   : > { %p1014_p8 = por %p60_p5, %p59_p3  ;;  %p224_p10 = scmp.eq.s32.totalorder %s701_s9, 1 }
  0x11   : > { %p1018_p9 = por %p218_p6, %p53_p1  ;;  %p742_p13 = scmp.lt.s32.totalorder %s918_s8, 2 }
  0x12   : > { %s1023_s16 = scalar_select %p44_p7, %s906_s28, %s46_s11  }
  0x13   : > { %s1183_s15 = scalar_select %p1018_p9, 1, 0 }
  0x14   : > { %p1025_p11 = por %p224_p10, %p59_p3  ;;  %s259_s18 = sand.u32 1, %s906_s28  }
  0x15   : > { %s704_s19 = sshll.u32 %s259_s18, 3  ;;  %s725_s20 = sshll.u32 %s914_s30, 7 }
  0x16   : > { %s1184_s17 = scalar_select %p1025_p11, 1, 0 }
  0x17   : > { %s1036_s23 = scalar_lea.hbm %s1172_s0, %s725_s20  ;;  %s263_s24 = scalar_lea.vmem [#allocation3], %s704_s19 }
  0x18   : > { %s273_s25 = sshll.u32 %s263_s24, 4  ;;  %p1042_p0 = pnand %p742_p13, %p1008_p4  ;;  %s1038_s25 = int_to_ptr.vmem [resolvable:$true] %s273_s25 }
  0x19   : > { %s260_s9 = scalar_lea.sflag [#allocation4], %s259_s18  ;;  %s806_s11 = scalar_lea.hbm %s1036_s23, 128 }
  0x1a   : > { %p807_p3 = scmp.ne.s32.totalorder %s1036_s23, %s806_s11  ;;  %p808_p5 = pneg %p1042_p0 }
  0x1b   : > { %s811_s12 = scalar_lea.hbm %s1172_s0, 256  ;;  %p812_p4 = scmp.lt.u32.totalorder %s1036_s23, %s1172_s0 }
  0x1c   : > { %p809_p6 = pnand %p808_p5, %p807_p3  ;;  %p813_p10 = scmp.lt.u32.totalorder %s811_s12, %s806_s11 }
  0x1d   : > { %p815_p12 = scmp.lt.u32.totalorder %s806_s11, %s1036_s23 }
  0x1e   : > { %p810_p7 = pneg %p809_p6  ;;  %p814_p13 = por %p813_p10, %p812_p4 }
  0x20   : > { %p816_p1 = por %p815_p12, %p814_p13 }
  0x22   : > { %p817_p2 = pnand %p816_p1, %p810_p7 }
  0x24   : > { %820 = shalt.err (!%p817_p2)
}
  0x25   : > { %s821_s18 = scalar_lea.vmem %s1038_s25, 128  ;;  %s920_s22 = smov [#allocation3]  }
  0x26   : > { %p822_p3 = scmp.ne.s32.totalorder %s1038_s25, %s821_s18  ;;  %s826_s24 = sshll.u32 %s920_s22, 4  ;;  %s827_s24 = int_to_ptr.vmem [resolvable:$false] %s826_s24 }
  0x27   : > { %s828_s13 = scalar_lea.vmem %s827_s24, 256  ;;  %p829_p9 = scmp.lt.s32.totalorder %s1038_s25, %s827_s24 }
  0x28   : > { %p824_p6 = pnand %p822_p3, %p808_p5  ;;  %p830_p4 = scmp.lt.s32.totalorder %s828_s13, %s821_s18 }
  0x2a   : > { %p825_p11 = pneg %p824_p6  ;;  %p831_p10 = por %p830_p4, %p829_p9 }
  0x2c   : > { %p832_p12 = pnand %p831_p10, %p825_p11 }
  0x2e   : > { %835 = shalt.err (!%p832_p12)
}
  0x2f   : > { %737 = dma.hbm_to_vmem [thread:$0]  (!%p1042_p0), %s1036_s23, 128, %s1038_s25, %s260_s9  }
  0x30   : > { %p1186_p1 = scmp.lt.s32.totalorder %s918_s8, 3  ;;  %p1187_p2 = scmp.ge.s32.totalorder %s918_s8, 1 }
  0x32   : > { %p292_p5 = pnand %p1187_p2, %p1186_p1 }
  0x33   : > { %s1078_s11 = sand.u32 (!%p292_p5), 1, %s902_s27  }
  0x34   : > { %295 = sbr.rel (%p292_p5) target bundleno = 351 (0x15f), region = 48  ;;  %s708_s19 = sshll.u32 (!%p292_p5), %s1078_s11, 3 }
  0x35   : > { %s298_s12 = scalar_lea.sflag (!%p292_p5), [#allocation4], %s1078_s11  ;;  %s301_s6 = scalar_lea.vmem (!%p292_p5), [#allocation3], %s708_s19 }
  0x3b   : > { %889 = dma.done.wait (%p1014_p8), %s298_s12, 128  }
  0x3c   : > { %891 = vsyncadd (%p1014_p8), %s298_s12, 4294967168  ;;  %p343_p9 = scmp.lt.s32.totalorder %s910_s29, 1  ;;  %v921_v1 = vmov 0.0   ;;  %v922_v2 = vmov 0   ;;  %vm363_vm0 = vcmask 1043456   ;;  %v353_v4 = vld [vmem:[%s301_s6] sm:$0xff]  ;;  %v557_v24 = vlaneseq }
  0x3d   : > { %432 = vmatprep.mubr.f32.mxu1 %v921_v1  ;;  %512 = vmatprep.mubr.f32.mxu0 %v921_v1  ;;  %v440_v6 = vcombine.high %v353_v4, %v353_v4  ;;  %v519_v7 = vld [vmem:[%s1176_s4] sm:$0xf]  ;;  %vm359_vm1 = vcmask 31744   ;;  %s340_s9 = scalar_lea.vmem [#allocation6], %s708_s19  ;;  %s582_s22 = scalar_lea.sflag [#allocation5], %s1078_s11 }
  0x3e   : > { %s344_s23 = scalar_select %p343_p9, %s910_s29, 1  ;;  %794 = vset.pattern.permute.xlu0 %v922_v2  ;;  %795 = vset.pattern.permute.xlu1 %v922_v2  ;;  %v356_v8 = vld [vmem:[%s1175_s3] sm:$0xf]  ;;  %v558_v30 = vshrl.u32 %v557_v24, 7 }
  0x3f   : > { %v355_v9 = vld [vmem:[%s1174_s2] sm:$0xf]  ;;  %522 = vperm.xlu0 %794, %v519_v7   ;;  %715 = vmatprep.subr.msk.mxu0 %vm363_vm0, %v440_v6  ;;  %s598_s20 = sshll.u32 %s340_s9, 4  ;;  %p1188_p11 = scmp.ne.s32.totalorder %s1183_s15, 0  ;;  %s1125_s20 = int_to_ptr.vmem [resolvable:$true] %s598_s20 }
  0x40   : > { %s726_s25 = sshll.u32 %s344_s23, 3  ;;  %v529_v10 = vld [vmem:[%s1177_s5] sm:$0xf]  ;;  %716 = vmatpush1.msk.msra.mxu0 %vm363_vm0, %v353_v4  ;;  %v559_v35 = vsub.s32 0, %v558_v30  ;;  %s836_s24 = scalar_lea.vmem %s1125_s20, 128 }
  0x41   : > { %s350_s21 = scalar_lea.vmem %s1173_s1, %s726_s25  ;;  %v551_v11 = vld [vmem:[#allocation2] sm:$0x1]  ;;  %717 = vmatmul.mubr.msk.f32.vlgmr.msra.gmra.mrb[0].mxu0 %vm359_vm1, %v355_v9  ;;  %s727_s25 = sshll.u32 %s910_s29, 7 }
  0x42   : > { %v1093_v3 = vld [vmem:[%s350_s21] sm:$0xff]  ;;  %554 = vperm.xlu1 %795, %v551_v11   ;;  %s1123_s18 = scalar_lea.hbm %s1179_s7, %s727_s25  ;;  %p837_p8 = scmp.ne.s32.totalorder %s1125_s20, %s836_s24 }
  0x43   : > { %v358_v5 = vcombine.high %v1093_v3, %v1093_v3  ;;  %532 = vperm.xlu0 %794, %v529_v10   ;;  %s923_s29 = smov [#allocation6]  }
  0x44   : > { %p838_p0 = pnand %p837_p8, %p1188_p11  ;;  %s840_s19 = sshll.u32 %s923_s29, 4  ;;  %s841_s19 = int_to_ptr.vmem [resolvable:$false] %s840_s19 }
  0x45   : > { %712 = vmatprep.subr.msk.mxu1 %vm363_vm0, %v358_v5  ;;  %s842_s13 = scalar_lea.vmem %s841_s19, 256  ;;  %p843_p13 = scmp.lt.s32.totalorder %s1125_s20, %s841_s19 }
  0x46   : > { %713 = vmatpush1.msk.msra.mxu1 %vm363_vm0, %v1093_v3  ;;  %p839_p7 = pneg %p838_p0  ;;  %p844_p3 = scmp.lt.s32.totalorder %s842_s13, %s836_s24 }
  0x47   : > { %714 = vmatmul.mubr.msk.f32.vlgmr.msra.gmra.mrb[0].mxu1 %vm359_vm1, %v356_v8 }
  0x48   : > { %p845_p6 = por %p844_p3, %p843_p13 }
  0x4a   : > { %p846_p4 = pnand %p845_p6, %p839_p7 }
  0xbe   : > { %v523_v12 = vpop.permute.xlu0 %522 }
  0xc1   : > { %v555_v37 = vpop.permute.xlu1 %554 }
  0xc2   : > { %v533_v22 = vpop.permute.xlu0 %532  ;;  %v560_v41 = vrot.slane %v555_v37, %v559_v35 }
 0x114   : > { %v514_v14 = vpop.f32.mrb[0].mxu0 }
 0x115   : > { %v516_v17 = vpop.f32.mrb[1].mxu0 }
 0x11a   : > { %v434_v13 = vpop.f32.mrb[0].mxu1 }
 0x11b   : > { %v515_v15 = vadd.f32 %v514_v14, %v434_v13  ;;  %v436_v16 = vpop.f32.mrb[1].mxu1 }
 0x11c   : > { %v517_v18 = vadd.f32 %v516_v17, %v436_v16 }
 0x11d   : > { %v525_v19 = vadd.f32 %v523_v12, %v515_v15 }
 0x11e   : > { %v526_v20 = vadd.f32 %v523_v12, %v517_v18 }
 0x11f   : > { %v527_v21 = vmax.f32 %v525_v19, 0.0 }
 0x120   : > { %v528_v23 = vmax.f32 %v526_v20, 0.0 }
 0x121   : > { %v535_v25 = vmul.f32 %v533_v22, %v527_v21 }
 0x122   : > { %v536_v26 = vmul.f32 %v533_v22, %v528_v23 }
 0x123   : > { %v537_v27 = vsel %vm363_vm0, %v535_v25, 0.0 }
 0x124   : > { %v538_v28 = vrot.slane %v537_v27, 4  ;;  %v544_v29 = vsel %vm363_vm0, %v536_v26, 0.0 }
 0x125   : > { %v545_v31 = vrot.slane %v544_v29, 4 }
 0x126   : > { %v539_v32 = vadd.f32 %v538_v28, %v537_v27 }
 0x127   : > { %v546_v33 = vadd.f32 %v545_v31, %v544_v29 }
 0x128   : > { %v540_v34 = vrot.slane %v539_v32, 2 }
 0x129   : > { %v547_v36 = vrot.slane %v546_v33, 2 }
 0x12a   : > { %v541_v38 = vadd.f32 %v540_v34, %v539_v32 }
 0x12b   : > { %v548_v39 = vadd.f32 %v547_v36, %v546_v33 }
 0x12c   : > { %v542_v40 = vrot.slane %v541_v38, 1 }
 0x12d   : > { %v549_v42 = vrot.slane %v548_v39, 1 }
 0x12e   : > { %v543_v43 = vadd.f32 %v542_v40, %v541_v38 }
 0x12f   : > { %v550_v44 = vadd.f32 %v549_v42, %v548_v39 }
 0x130   : > { %v561_v45 = vadd.f32 %v560_v41, %v543_v43 }
 0x131   : > { %v562_v46 = vadd.f32 %v560_v41, %v550_v44 }
 0x132   : > { %v718_v47 = vmul.f32 -1.442695, %v561_v45 }
 0x133   : > { %v719_v48 = vmul.f32 -1.442695, %v562_v46 }
 0x134   : > { %798 = vpow2.f32 %v718_v47 }
 0x135   : > { %800 = vpow2.f32 %v719_v48 }
 0x13e   : > { %v799_v49 = vpop.eup %798 }
 0x13f   : > { %v801_v50 = vpop.eup %800  ;;  %v569_v51 = vadd.f32 1.0, %v799_v49 }
 0x140   : > { %v570_v52 = vadd.f32 1.0, %v801_v50 }
 0x141   : > { %802 = vrcp.f32 %v569_v51 }
 0x142   : > { %804 = vrcp.f32 %v570_v52 }
 0x14b   : > { %v803_v53 = vpop.eup %802 }
 0x14c   : > { %v805_v54 = vpop.eup %804 }
 0x14d   : > { %v577_v55 = vcombine.low %v803_v53, %v805_v54 }
 0x14f   : > { %v579_v56 = vmul.f32 %v577_v55, %v1093_v3 }
 0x151   : > { %580 = vst [vmem:[%s340_s9] sm:$0xff] %v579_v56 }
 0x152   : > { %849 = shalt.err (!%p846_p4)
}
 0x153   : > { %s850_s11 = scalar_lea.hbm %s1123_s18, 128  ;;  %s854_s23 = scalar_lea.hbm %s1179_s7, 256 }
 0x154   : > { %p851_p10 = scmp.ne.s32.totalorder %s1123_s18, %s850_s11  ;;  %p855_p2 = scmp.lt.u32.totalorder %s1123_s18, %s1179_s7 }
 0x155   : > { %p856_p5 = scmp.lt.u32.totalorder %s854_s23, %s850_s11  ;;  %p858_p8 = scmp.lt.u32.totalorder %s850_s11, %s1123_s18 }
 0x156   : > { %p852_p12 = pnand %p851_p10, %p1188_p11 }
 0x157   : > { %p857_p9 = por %p856_p5, %p855_p2 }
 0x158   : > { %p853_p1 = pneg %p852_p12 }
 0x159   : > { %p859_p0 = por %p858_p8, %p857_p9 }
 0x15b   : > { %p860_p7 = pnand %p859_p0, %p853_p1 }
 0x15d   : > { %863 = shalt.err (!%p860_p7)
}
 0x15e   : > { %732 = dma.vmem_to_hbm [thread:$0]  (%p1188_p11), %s1125_s20, 128, %s1123_s18, %s582_s22  }
 0x15f PF: > { %s610_s21 = sand.u32 1, %s898_s26   ;;  %p1189_p13 = scmp.ne.s32.totalorder %s1184_s17, 0 }
 0x160   : > { %p1190_p3 = scmp.ge.s32.totalorder %s918_s8, 2  ;;  %s611_s14 = scalar_lea.sflag [#allocation5], %s610_s21 }
 0x162   : > { %p739_p6 = pnand %p1190_p3, %p1189_p13 }
 0x164   : > { %893 = dma.done.wait (!%p739_p6), %s611_s14, 128  }
 0x165   : > { %895 = vsyncadd (!%p739_p6), %s611_s14, 4294967168  ;;  %s25_s8 = sadd.s32 1, %s918_s8   ;;  %s1191_s26 = smov %s902_s27 }
 0x166   : > { %p22_p4 = scmp.ge.s32.totalorder %s25_s8, 4   ;;  %s1192_s27 = smov %s906_s28 }
 0x167   : > { %s1193_s28 = smov %s1023_s16  ;;  %s1194_s29 = smov %s914_s30 }
 0x168   : > { %s1195_s30 = smov %s1197_s10  ;;  %24 = sbr.rel (!%p22_p4) target bundleno = 9 (0x9), region = 96 }
 0x16f   :  { %616 = vsyncpa [#allocation4], 1 }
 0x170   :  { %618 = vsyncpa [#allocation4 + $0x1], 1 }
 0x171   :  { %619 = vsyncpa [#allocation5], 1 }
 0x172   :  { %621 = vsyncpa [#allocation5 + $0x1], 1 }

</bundles_post_ra>
